<compile_context>
chip_gen: v5e
topology: v5e:2x2
jax: 0.10.0
libtpu: 0.0.40
codegen_flags: <defaults>
</compile_context>

<pallas_src>
import math
import functools

import jax
import jax.numpy as jnp
from jax.experimental import pallas as pl
from jax.experimental.pallas import tpu as pltpu


def _attention_kernel(x_ref, wqkv_ref, wout_ref, o_ref, *, n_heads, d_head,
                      compute_dtype):
    # x_ref:    (Bt, L, C)   block of batch rows (f32)
    # wqkv_ref: (C, 3C)      fused q/k/v projection weight, bf16 (native layout)
    # wout_ref: (C, C)       output projection weight, bf16 (native layout)
    # o_ref:    (Bt, L, C)
    H, D = n_heads, d_head
    Bt, L, C = x_ref.shape
    M = Bt * L
    BH = Bt * H
    cdt = compute_dtype

    # ---- Fused QKV projection: one lane-dense (M, C) @ (C, 3C) GEMM. ----
    x2d = x_ref[...].reshape(M, C).astype(cdt)                  # (M, C)
    qkv = jnp.dot(x2d, wqkv_ref[...],
                  preferred_element_type=jnp.float32)           # (M, 3C) f32

    # Split q/k/v and heads on major dims of the *result* (never the weight's
    # lane axis): fold lanes 3C -> (3H major, D lane), then slice the major axis.
    qkv = qkv.reshape(Bt, L, 3 * H, D)
    qkv = jnp.swapaxes(qkv, 1, 2)                               # (Bt, 3H, L, D)

    # Fold 1/sqrt(D) into q: BH*L*D multiplies instead of scaling (BH,L,L) scores.
    scale = 1.0 / math.sqrt(D)
    q = (qkv[:, 0:H] * scale).astype(cdt).reshape(BH, L, D)
    k = qkv[:, H:2 * H].astype(cdt).reshape(BH, L, D)
    v = qkv[:, 2 * H:3 * H].astype(cdt).reshape(BH, L, D)

    # ---- Attention scores for all (batch, head) pairs at once. ----
    s = jnp.einsum('bqd,bkd->bqk', q, k,
                   preferred_element_type=jnp.float32)          # (BH, L, L) f32

    # Causal mask (finite fill value -> no inf-inf NaN risk).
    row = jax.lax.broadcasted_iota(jnp.int32, (L, L), 0)
    col = jax.lax.broadcasted_iota(jnp.int32, (L, L), 1)
    s = jnp.where((col <= row)[None], s, -1e30)

    # Numerically-stable softmax in f32; denominator applied after P@V.
    m = jnp.max(s, axis=-1, keepdims=True)
    p = jnp.exp(s - m)
    denom = jnp.sum(p, axis=-1, keepdims=True)                  # (BH, L, 1) f32

    pv = jnp.einsum('bqk,bkd->bqd', p.astype(cdt), v,
                    preferred_element_type=jnp.float32)         # (BH, L, D) f32
    pv = pv * pl.reciprocal(denom, approx=True)

    # ---- Output projection: concat heads -> (M, C), one (M,C)@(C,C) GEMM. ----
    pv = jnp.swapaxes(pv.reshape(Bt, H, L, D), 1, 2)            # (Bt, L, H, D)
    pv = pv.reshape(M, C).astype(cdt)
    out = jnp.dot(pv, wout_ref[...],
                  preferred_element_type=jnp.float32)           # (M, C) f32

    # attn_dropout / resid_dropout are identity (dropout=0.0 / eval mode).
    o_ref[...] = out.reshape(Bt, L, C).astype(o_ref.dtype)


def _step_vmem_bytes(bt, L, C, H, D):
    """Rough f32-equivalent bytes of the per-grid-step activation working set."""
    M = bt * L
    BH = bt * H
    return 4 * (M * C             # x block
                + M * 3 * C       # fused qkv activations
                + 3 * BH * L * D  # q, k, v
                + 2 * BH * L * L  # scores + exp(scores)
                + BH * L * D      # pv
                + 2 * M * C)      # projected output + output block


def pack_attention_weights(w_qkv, w_out, compute_dtype=jnp.bfloat16):
    """One-time prepack (do this at parameter-init time, not per forward).

    Layouts are consumed as-is -- (C, 3C) and (C, C) in (in, out) order -- so the
    only packing work is the cast to the MXU compute dtype.
    """
    return w_qkv.astype(compute_dtype), w_out.astype(compute_dtype)


def causal_self_attention(x, w_qkv_packed, w_out_packed, *, n_heads, d_head,
                          compute_dtype=jnp.bfloat16, batch_block=None):
    """x: (B, L, C) f32; w_qkv_packed: (C, 3C) bf16; w_out_packed: (C, C) bf16."""
    B, L, C = x.shape
    H, D = n_heads, d_head
    assert C == H * D
    assert w_qkv_packed.shape == (C, 3 * C)
    assert w_out_packed.shape == (C, C)

    # Choose how many batch rows to process per grid step: largest divisor of B
    # whose working set fits a conservative budget (amortizes ~0.35us/step fixed
    # pipeline overhead and fills the MXU M dimension).
    if batch_block is None:
        budget = 8 * 2**20
        batch_block = 1
        for cand in range(1, B + 1):
            if B % cand == 0 and _step_vmem_bytes(cand, L, C, H, D) <= budget:
                batch_block = cand
    assert B % batch_block == 0
    Bt = batch_block
    grid = (B // Bt,)

    # Explicit scoped-VMEM limit: sized from the actual working set (activations
    # + double-buffered bf16 weights), clamped so it is safe on v7x (64 MiB VMEM).
    # On v6e this can be pushed toward ~100 MiB for large L if needed.
    weight_bytes = 2 * 2 * (w_qkv_packed.size + w_out_packed.size)
    need = _step_vmem_bytes(Bt, L, C, H, D) + weight_bytes
    vmem_limit = int(min(max(4 * need, 16 * 2**20), 48 * 2**20))

    flops = (2 * B * L * C * 3 * C        # fused qkv projection
             + 2 * B * H * L * L * D      # q @ k^T
             + 2 * B * H * L * L * D      # p @ v
             + 2 * B * L * C * C)         # output projection
    cost = pl.CostEstimate(
        flops=flops,
        transcendentals=B * H * L * L,
        bytes_accessed=(x.size * x.dtype.itemsize
                        + w_qkv_packed.size * w_qkv_packed.dtype.itemsize
                        + w_out_packed.size * w_out_packed.dtype.itemsize
                        + B * L * C * x.dtype.itemsize))

    kernel = functools.partial(_attention_kernel, n_heads=H, d_head=D,
                               compute_dtype=compute_dtype)
    return pl.pallas_call(
        kernel,
        out_shape=jax.ShapeDtypeStruct((B, L, C), x.dtype),
        grid_spec=pltpu.PrefetchScalarGridSpec(
            num_scalar_prefetch=0,
            grid=grid,
            in_specs=[
                pl.BlockSpec((Bt, L, C), lambda b: (b, 0, 0)),
                # Constant block index -> weights stay resident across steps.
                pl.BlockSpec((C, 3 * C), lambda b: (0, 0)),
                pl.BlockSpec((C, C), lambda b: (0, 0)),
            ],
            out_specs=pl.BlockSpec((Bt, L, C), lambda b: (b, 0, 0)),
        ),
        compiler_params=pltpu.CompilerParams(
            dimension_semantics=("parallel",),
            vmem_limit_bytes=vmem_limit),
        cost_estimate=cost,
    )(x, w_qkv_packed, w_out_packed)


def reference_attention(x, w_qkv, w_out, *, n_heads, d_head):
    """Pure-JAX f32 reference mirroring the PyTorch forward (dropout=0)."""
    B, L, C = x.shape
    qkv = x @ w_qkv                                    # (B, L, 3C)
    q, k, v = jnp.split(qkv, 3, axis=-1)

    def heads(t):  # (B, L, C) -> (B, H, L, D)
        return t.reshape(B, L, n_heads, d_head).transpose(0, 2, 1, 3)

    q, k, v = heads(q), heads(k), heads(v)
    attn = (q @ jnp.swapaxes(k, -2, -1)) * (1.0 / math.sqrt(d_head))
    mask = jnp.tril(jnp.ones((L, L), dtype=bool))
    attn = jnp.where(mask[None, None], attn, -jnp.inf)
    attn = jax.nn.softmax(attn, axis=-1)
    out = (attn @ v).transpose(0, 2, 1, 3).reshape(B, L, C)
    return out @ w_out


if __name__ == "__main__":
    # Module config: embed_dim_per_head=8, n_heads=4 -> C=32, block_size>=L,
    # dropout=0.0, bias=False.
    B, L = 2, 8
    n_heads, d_head = 4, 8
    C = n_heads * d_head

    key = jax.random.PRNGKey(0)
    kx, kq, ko = jax.random.split(key, 3)

    x = jax.random.normal(kx, (B, L, C), dtype=jnp.float32)
    bound = 1.0 / math.sqrt(C)
    w_qkv = jax.random.uniform(kq, (C, 3 * C), jnp.float32, -bound, bound)
    w_out = jax.random.uniform(ko, (C, C), jnp.float32, -bound, bound)

    # One-time weight prepack (hoisted out of the per-call path).
    w_qkv_p, w_out_p = pack_attention_weights(w_qkv, w_out)

    out = causal_self_attention(x, w_qkv_p, w_out_p,
                                n_heads=n_heads, d_head=d_head)
    out = jax.block_until_ready(out)

    ref = reference_attention(x, w_qkv, w_out, n_heads=n_heads, d_head=d_head)
    assert out.shape == (B, L, C)
    # bf16 MXU operands with f32 accumulation: compare against the f32
    # reference at a correspondingly relaxed tolerance.
    assert jnp.allclose(out, ref, atol=3e-2, rtol=3e-2), "mismatch vs reference"

    print("KERNEL_OK")
</pallas_src>

<mosaic_0001>
module attributes {stable_mosaic.version = 11 : i64} {
  func.func @_attention_kernel(%arg0: i32, %arg1: memref<2x8x32xf32, #tpu.memory_space<vmem>>, %arg2: memref<32x96xbf16, #tpu.memory_space<vmem>>, %arg3: memref<32x32xbf16, #tpu.memory_space<vmem>>, %arg4: memref<2x8x32xf32, #tpu.memory_space<vmem>>) attributes {dimension_semantics = [#tpu.dimension_semantics<parallel>], iteration_bounds = array<i64: 1>, scalar_prefetch = 0 : i64, scratch_operands = 0 : i64, tpu.core_type = #tpu.core_type<tc>, window_params = [{transform_indices = @transform_0, window_bounds = array<i64: 2, 8, 32>}, {pipeline_mode = #tpu.pipeline_mode<synchronous>, transform_indices = @transform_1, window_bounds = array<i64: 32, 96>}, {pipeline_mode = #tpu.pipeline_mode<synchronous>, transform_indices = @transform_2, window_bounds = array<i64: 32, 32>}, {transform_indices = @transform_3, window_bounds = array<i64: 2, 8, 32>}]} {
    %c0 = arith.constant 0 : index
    %c0_0 = arith.constant 0 : index
    %c0_1 = arith.constant 0 : index
    %0 = vector.load %arg1[%c0, %c0_0, %c0_1] : memref<2x8x32xf32, #tpu.memory_space<vmem>>, vector<2x8x32xf32>
    %1 = vector.shape_cast %0 : vector<2x8x32xf32> to vector<16x32xf32>
    %2 = arith.truncf %1 : vector<16x32xf32> to vector<16x32xbf16>
    %c0_2 = arith.constant 0 : index
    %c0_3 = arith.constant 0 : index
    %3 = vector.load %arg2[%c0_2, %c0_3] : memref<32x96xbf16, #tpu.memory_space<vmem>>, vector<32x96xbf16>
    %cst = arith.constant dense<0.000000e+00> : vector<16x96xf32>
    %4 = tpu.matmul %2, %3, %cst {dimension_numbers = #tpu.dot_dimension_numbers<[1], [0], [0], [1], [0, 0, 1, 1], [], []>} : vector<16x32xbf16>, vector<32x96xbf16>, vector<16x96xf32> -> vector<16x96xf32>
    %5 = vector.shape_cast %4 : vector<16x96xf32> to vector<2x8x12x8xf32>
    %6 = tpu.transpose %5, [0, 2, 1, 3] : vector<2x8x12x8xf32> -> vector<2x12x8x8xf32>
    %7 = vector.extract_strided_slice %6 {offsets = [0, 0, 0, 0], sizes = [2, 4, 8, 8], strides = [1, 1, 1, 1]} : vector<2x12x8x8xf32> to vector<2x4x8x8xf32>
    %cst_4 = arith.constant 0.353553385 : f32
    %8 = vector.broadcast %cst_4 : f32 to vector<2x4x8x8xf32>
    %9 = arith.mulf %7, %8 : vector<2x4x8x8xf32>
    %10 = arith.truncf %9 : vector<2x4x8x8xf32> to vector<2x4x8x8xbf16>
    %11 = vector.shape_cast %10 : vector<2x4x8x8xbf16> to vector<8x8x8xbf16>
    %12 = vector.extract_strided_slice %6 {offsets = [0, 4, 0, 0], sizes = [2, 4, 8, 8], strides = [1, 1, 1, 1]} : vector<2x12x8x8xf32> to vector<2x4x8x8xf32>
    %13 = arith.truncf %12 : vector<2x4x8x8xf32> to vector<2x4x8x8xbf16>
    %14 = vector.shape_cast %13 : vector<2x4x8x8xbf16> to vector<8x8x8xbf16>
    %15 = vector.extract_strided_slice %6 {offsets = [0, 8, 0, 0], sizes = [2, 4, 8, 8], strides = [1, 1, 1, 1]} : vector<2x12x8x8xf32> to vector<2x4x8x8xf32>
    %16 = arith.truncf %15 : vector<2x4x8x8xf32> to vector<2x4x8x8xbf16>
    %17 = vector.shape_cast %16 : vector<2x4x8x8xbf16> to vector<8x8x8xbf16>
    "tpu.trace_start"() <{level = 10 : i32, message = "bqd,bkd->bqk"}> : () -> ()
    %cst_5 = arith.constant dense<0.000000e+00> : vector<8x8x8xf32>
    %18 = tpu.matmul %11, %14, %cst_5 {dimension_numbers = #tpu.dot_dimension_numbers<[2], [2], [1], [1], [0, 0, 0, 1, 1, 1], [0], [0]>} : vector<8x8x8xbf16>, vector<8x8x8xbf16>, vector<8x8x8xf32> -> vector<8x8x8xf32>
    "tpu.trace_stop"() : () -> ()
    %19 = tpu.iota {dimensions = array<i32: 0>} : vector<8x8xi32>
    %20 = tpu.iota {dimensions = array<i32: 1>} : vector<8x8xi32>
    %21 = arith.cmpi sle, %20, %19 : vector<8x8xi32>
    %22 = vector.shape_cast %21 : vector<8x8xi1> to vector<1x8x8xi1>
    %cst_6 = arith.constant -1.000000e+30 : f32
    %23 = vector.shape_cast %22 : vector<1x8x8xi1> to vector<1x8x8xi1>
    %24 = vector.broadcast %23 : vector<1x8x8xi1> to vector<8x8x8xi1>
    %25 = vector.broadcast %cst_6 : f32 to vector<8x8x8xf32>
    %26 = arith.select %24, %18, %25 : vector<8x8x8xi1>, vector<8x8x8xf32>
    %cst_7 = arith.constant dense<0xFF800000> : vector<8x8xf32>
    %27 = vector.multi_reduction <maximumf>, %26, %cst_7 [2] : vector<8x8x8xf32> to vector<8x8xf32>
    %28 = vector.shape_cast %27 : vector<8x8xf32> to vector<8x8x1xf32>
    %29 = vector.broadcast %28 : vector<8x8x1xf32> to vector<8x8x8xf32>
    %30 = arith.subf %26, %29 : vector<8x8x8xf32>
    %31 = math.exp %30 : vector<8x8x8xf32>
    %cst_8 = arith.constant dense<0.000000e+00> : vector<8x8xf32>
    %32 = vector.multi_reduction <add>, %31, %cst_8 [2] : vector<8x8x8xf32> to vector<8x8xf32>
    %33 = vector.shape_cast %32 : vector<8x8xf32> to vector<8x8x1xf32>
    %34 = arith.truncf %31 : vector<8x8x8xf32> to vector<8x8x8xbf16>
    "tpu.trace_start"() <{level = 10 : i32, message = "bqk,bkd->bqd"}> : () -> ()
    %cst_9 = arith.constant dense<0.000000e+00> : vector<8x8x8xf32>
    %35 = tpu.matmul %34, %17, %cst_9 {dimension_numbers = #tpu.dot_dimension_numbers<[2], [1], [1], [2], [0, 0, 0, 1, 1, 2], [0], [0]>} : vector<8x8x8xbf16>, vector<8x8x8xbf16>, vector<8x8x8xf32> -> vector<8x8x8xf32>
    "tpu.trace_stop"() : () -> ()
    %36 = tpu.reciprocal %33 {approx = true} : vector<8x8x1xf32> -> vector<8x8x1xf32>
    %37 = vector.broadcast %36 : vector<8x8x1xf32> to vector<8x8x8xf32>
    %38 = arith.mulf %35, %37 : vector<8x8x8xf32>
    %39 = vector.shape_cast %38 : vector<8x8x8xf32> to vector<2x4x8x8xf32>
    %40 = tpu.transpose %39, [0, 2, 1, 3] : vector<2x4x8x8xf32> -> vector<2x8x4x8xf32>
    %41 = vector.shape_cast %40 : vector<2x8x4x8xf32> to vector<16x32xf32>
    %42 = arith.truncf %41 : vector<16x32xf32> to vector<16x32xbf16>
    %c0_10 = arith.constant 0 : index
    %c0_11 = arith.constant 0 : index
    %43 = vector.load %arg3[%c0_10, %c0_11] : memref<32x32xbf16, #tpu.memory_space<vmem>>, vector<32x32xbf16>
    %cst_12 = arith.constant dense<0.000000e+00> : vector<16x32xf32>
    %44 = tpu.matmul %42, %43, %cst_12 {dimension_numbers = #tpu.dot_dimension_numbers<[1], [0], [0], [1], [0, 0, 1, 1], [], []>} : vector<16x32xbf16>, vector<32x32xbf16>, vector<16x32xf32> -> vector<16x32xf32>
    %45 = vector.shape_cast %44 : vector<16x32xf32> to vector<2x8x32xf32>
    %c0_13 = arith.constant 0 : index
    %c0_14 = arith.constant 0 : index
    %c0_15 = arith.constant 0 : index
    %46 = vector.load %arg4[%c0_13, %c0_14, %c0_15] : memref<2x8x32xf32, #tpu.memory_space<vmem>>, vector<2x8x32xf32>
    tpu.vector_store %arg4[%c0_13, %c0_14, %c0_15], %45 {strides = array<i32>} : memref<2x8x32xf32, #tpu.memory_space<vmem>>, vector<2x8x32xf32>,
    return
  }
  func.func @transform_0(%arg0: i32) -> (i32, i32, i32) {
    %c0_i32 = arith.constant 0 : i32
    %c0_i32_0 = arith.constant 0 : i32
    %c0_i32_1 = arith.constant 0 : i32
    return %arg0, %c0_i32, %c0_i32_0 : i32, i32, i32
  }
  func.func @transform_1(%arg0: i32) -> (i32, i32) {
    %c0_i32 = arith.constant 0 : i32
    %c0_i32_0 = arith.constant 0 : i32
    %c0_i32_1 = arith.constant 0 : i32
    return %c0_i32, %c0_i32_0 : i32, i32
  }
  func.func @transform_2(%arg0: i32) -> (i32, i32) {
    %c0_i32 = arith.constant 0 : i32
    %c0_i32_0 = arith.constant 0 : i32
    %c0_i32_1 = arith.constant 0 : i32
    return %c0_i32, %c0_i32_0 : i32, i32
  }
  func.func @transform_3(%arg0: i32) -> (i32, i32, i32) {
    %c0_i32 = arith.constant 0 : i32
    %c0_i32_0 = arith.constant 0 : i32
    %c0_i32_1 = arith.constant 0 : i32
    return %arg0, %c0_i32, %c0_i32_0 : i32, i32, i32
  }
}

</mosaic_0001>

<bundles_post_ra>
// kernel: tpu_custom_call.1
= control target key start
LH: loop header
LB: loop body
LE: loop exit
PB: predicated region body
PF: predicated region fallthrough
CT: control target
= control target key end

     0   :  { %8 = vsyncpa [#allocation3], 0  ;;  %s2534_s0 = inlined_call_operand.hbm [shape: f32[2,8,32], index: 0, kind: input, shape index: {}]   ;;  %s2535_s1 = inlined_call_operand.hbm [shape: bf16[32,96], index: 1, kind: input, shape index: {}]   ;;  %s2536_s2 = inlined_call_operand.hbm [shape: bf16[32,32], index: 2, kind: input, shape index: {}]   ;;  %s2537_s3 = inlined_call_operand.hbm [shape: f32[2,8,32], index: 3, kind: output, shape index: {}]  }
   0x1   :  { %9 = vsyncpa [#allocation6], 0  ;;  %s28_s14 = sshll.u32 %s2535_s1, 4  ;;  %s29_s14 = int_to_ptr.hbm [resolvable:$true] %s28_s14 }
   0x2   :  { %10 = vsyncpa [#allocation4], 0  ;;  %s1823_s15 = smov [#allocation5]   ;;  %s15_s19 = sshll.u32 %s2534_s0, 4  ;;  %s16_s19 = int_to_ptr.hbm [resolvable:$true] %s15_s19 }
   0x3   :  { %s30_s16 = sshll.u32 %s1823_s15, 4  ;;  %s1824_s20 = smov 64   ;;  %s31_s16 = int_to_ptr.vmem [resolvable:$true] %s30_s16 }
   0x4   :  { %s1825_s21 = smov 4   ;;  %s1826_s22 = smov [#allocation2]  }
   0x5   :  { %36 = dma.hbm_to_vmem [thread:$0]  %s29_s14, 256, %s31_s16, [#allocation6], %s1824_s20, %s1824_s20, %s1825_s21  }
   0x6   :  { %s17_s23 = sshll.u32 %s1826_s22, 4  ;;  %s1827_s24 = smov 128   ;;  %s18_s23 = int_to_ptr.vmem [resolvable:$true] %s17_s23 }
   0x7   :  { %s1828_s1 = smov 8   ;;  %s41_s27 = sshll.u32 %s2536_s2, 4  ;;  %s42_s27 = int_to_ptr.hbm [resolvable:$true] %s41_s27 }
   0x8   :  { %23 = dma.hbm_to_vmem [thread:$0]  %s16_s19, 256, %s18_s23, [#allocation3], %s1827_s24, %s1827_s24, %s1828_s1  }
   0x9   :  { %s1829_s0 = smov [#allocation7]  }
   0xa   :  { %s43_s28 = sshll.u32 %s1829_s0, 4  ;;  %s44_s28 = int_to_ptr.vmem [resolvable:$true] %s43_s28 }
   0xb   :  { %49 = dma.hbm_to_vmem [thread:$0]  %s42_s27, 256, %s44_s28, [#allocation6], %s1824_s20, %s1824_s20, %s1825_s21  }
   0xc   :  { %1817 = dma.done.wait [#allocation3], 256  }
   0xd   :  { %1818 = vsyncadd [#allocation3], 4294967040 }
   0xe   :  { %1819 = dma.done.wait [#allocation6], 512  }
   0xf   :  { %1820 = vsyncadd [#allocation6], 4294966784  ;;  %v1629_v0 = vld [vmem:[#allocation5 + $0x8] sm:$0xff]  ;;  %v1628_v1 = vld [vmem:[#allocation5] sm:$0xff]  ;;  %vm82_vm0 = vcmask 261120   ;;  %s1830_s2 = smov 104  }
  0x10   :  { %92 = vmatpush.bf16.msra.mxu0 %v1629_v0  ;;  %v63_v2 = vld [vmem:[#allocation2] sm:$0xff]  ;;  %v64_v3 = vld [vmem:[#allocation2 + $0x8] sm:$0xff]  ;;  %s1831_s29 = smov 96   ;;  %s1832_s30 = smov 88   ;;  %v1840_v11 = vmov 1983009808  }
  0x11   :  { %v65_v4 = vpack.c.bf16 %v64_v3, %v63_v2  ;;  %s1833_s4 = smov 80   ;;  %s1834_s5 = smov 72   ;;  %v174_v12 = vunpack.c.l.s4 %v1840_v11  ;;  %vm169_vm1 = vcmask 1047556   ;;  %v1841_v25 = vmov 1934713408  }
  0x12   :  { %s1835_s6 = smov 120   ;;  %s1836_s7 = smov 112   ;;  %v222_v26 = vunpack.c.l.s4 %v1841_v25  ;;  %vm869_vm2 = vcmask 64512   ;;  %vm1120_vm3 = vcmask 1043456   ;;  %vm1532_vm5 = vcmask 130048  }
  0x13   :  { %s1837_s8 = smov 40   ;;  %s1838_s9 = smov 48   ;;  %v1903_v18 = vunpack.c.0.s8 %v174_v12  ;;  %vm1535_vm6 = vcmask 195584  }
  0x14   :  { %93 = vmatpush.bf16.msra.mxu0 %v1628_v1  ;;  %s1839_s10 = smov 56   ;;  %v1918_v40 = vunpack.c.0.s8 %v222_v26  ;;  %s1842_s11 = smov 16  }
  0x15   :  { %s1843_s12 = smov 24   ;;  %s1844_s13 = smov [#allocation8]  }
  0x16   :  { %s1578_s14 = sshll.u32 %s1844_s13, 4  ;;  %s1580_s17 = sshll.u32 %s2537_s3, 4  ;;  %s1579_s14 = int_to_ptr.vmem [resolvable:$true] %s1578_s14  ;;  %s1581_s17 = int_to_ptr.hbm [resolvable:$true] %s1580_s17 }
  0x17   :  { %1602 = vmatmul.msk.bf16.vlgmr.msra.gmra.mxu0 %vm82_vm0, %v65_v4 }
  0x94   :  { %v1882_v5 = vpop.f32.mrf.mxu0 }
  0x95   :  { %114 = vrot.lane.b32.xlu2 %v1882_v5, %s1830_s2  ;;  %120 = vrot.lane.b32.xlu1 %v1882_v5, %s1831_s29  ;;  %v171_v55 = vrot.slane %v1882_v5, 4 }
  0x96   :  { %126 = vrot.lane.b32.xlu0 %v1882_v5, %s1832_s30 }
  0x9c   :  { %v1890_v6 = vpop.f32.mrf.mxu0 }
  0x9d   :  { %132 = vrot.lane.b32.xlu2 %v1882_v5, %s1833_s4  ;;  %138 = vrot.lane.b32.xlu1 %v1882_v5, %s1834_s5  ;;  %v1654_v7 = vpack.i.bf16 %v1890_v6, %v1882_v5  ;;  %v339_v2 = vrot.slane %v1890_v6, 4 }
  0x9e   :  { %102 = vrot.lane.b32.xlu0 %v1882_v5, %s1835_s6 }
  0xa5   :  { %104 = vrot.lane.b32.xlu2 %v1890_v6, %s1835_s6  ;;  %128 = vrot.lane.b32.xlu1 %v1890_v6, %s1832_s30 }
  0xa6   :  { %108 = vrot.lane.b32.xlu0 %v1882_v5, %s1836_s7 }
  0xad   :  { %116 = vrot.lane.b32.xlu2 %v1890_v6, %s1830_s2  ;;  %140 = vrot.lane.b32.xlu1 %v1890_v6, %s1834_s5 }
  0xae   :  { %122 = vrot.lane.b32.xlu0 %v1890_v6, %s1831_s29 }
  0xb5   :  { %1655 = vrot.lane.b32.xlu2 %v1654_v7, %s1824_s20  ;;  %110 = vrot.lane.b32.xlu1 %v1890_v6, %s1836_s7 }
  0xb6   :  { %134 = vrot.lane.b32.xlu0 %v1890_v6, %s1833_s4 }
  0xbd   :  { %1670 = vrot.lane.b32.xlu2 %v1654_v7, %s1837_s8  ;;  %1665 = vrot.lane.b32.xlu1 %v1654_v7, %s1838_s9 }
  0xbe   :  { %1660 = vrot.lane.b32.xlu0 %v1654_v7, %s1839_s10 }
  0xef   :  { %v115_v8 = vpop.permute.xlu2 %114 }
  0xf0   :  { %v181_v34 = vrot.slane %v115_v8, 4 }
  0xf7   :  { %v133_v9 = vpop.permute.xlu2 %132 }
  0xf8   :  { %v193_v17 = vrot.slane %v133_v9, 4 }
  0xff   :  { %v105_v10 = vpop.permute.xlu2 %104 }
 0x100   :  { %v351_v21 = vrot.slane %v105_v10, 4 }
 0x107   :  { %v121_v13 = vpop.permute.xlu1 %120  ;;  %v117_v14 = vpop.permute.xlu2 %116 }
 0x108   :  { %v195_v15 = vrot.slane %v121_v13, 4  ;;  %v127_v16 = vpop.permute.xlu0 %126  ;;  %v194_v20 = vsel %vm169_vm1, %v193_v17, %v121_v13  ;;  %v349_v22 = vrot.slane %v117_v14, 4  ;;  %v352_v28 = vsel %vm169_vm1, %v117_v14, %v351_v21 }
 0x109   :  { %v207_v24 = vrot.slane %v127_v16, 4  ;;  %v200_v27 = vperm.slane %v194_v20, %v1903_v18  ;;  %v1916_v39 = vperm.slane %v352_v28, %v1903_v18 }
 0x10a   :  { %v196_v19 = vsel %vm169_vm1, %v133_v9, %v195_v15  ;;  %v350_v35 = vsel %vm169_vm1, %v349_v22, %v105_v10 }
 0x10b   :  { %v204_v23 = vperm.slane %v196_v19, %v1903_v18  ;;  %v243_v42 = vrot.slane %v200_v27, 4  ;;  %v1924_v46 = vperm.slane %v350_v35, %v1903_v18  ;;  %v397_v63 = vrot.slane %v1916_v39, 4 }
 0x10d   :  { %v255_v38 = vrot.slane %v204_v23, 4  ;;  %v385_v62 = vrot.slane %v1924_v46, 4 }
 0x10f   :  { %v139_v29 = vpop.permute.xlu1 %138  ;;  %v1910_v30 = vpop.permute.xlu2 %1655 }
 0x110   :  { %v205_v31 = vrot.slane %v139_v29, 4  ;;  %v208_v32 = vsel %vm169_vm1, %v139_v29, %v207_v24  ;;  %v103_v33 = vpop.permute.xlu0 %102  ;;  %v1658_v49 = vunpack.i.h.bf16 %v1910_v30  ;;  %v1657_v54 = vunpack.i.l.bf16 %v1910_v30 }
 0x111   :  { %v216_v36 = vperm.slane %v208_v32, %v1903_v18  ;;  %v183_v37 = vrot.slane %v103_v33, 4  ;;  %v182_v48 = vsel %vm169_vm1, %v181_v34, %v103_v33 }
 0x112   :  { %v206_v41 = vsel %vm169_vm1, %v205_v31, %v127_v16  ;;  %v188_v59 = vperm.slane %v182_v48, %v1903_v18  ;;  %v1946_v0 = vrot.slane %v1658_v49, 4  ;;  %v1954_v10 = vrot.slane %v1657_v54, 4 }
 0x113   :  { %v212_v43 = vperm.slane %v206_v41, %v1903_v18  ;;  %v253_v44 = vrot.slane %v216_v36, 4  ;;  %v184_v45 = vsel %vm169_vm1, %v115_v8, %v183_v37  ;;  %v256_v47 = vsel %vm169_vm1, %v216_v36, %v255_v38 }
 0x114   :  { %v192_v53 = vperm.slane %v184_v45, %v1903_v18  ;;  %v264_v58 = vperm.slane %v256_v47, %v1918_v40  ;;  %v217_v15 = vrot.slane %v188_v59, 4 }
 0x115   :  { %v241_v50 = vrot.slane %v212_v43, 4  ;;  %v244_v51 = vsel %vm169_vm1, %v212_v43, %v243_v42  ;;  %v254_v52 = vsel %vm169_vm1, %v253_v44, %v204_v23 }
 0x116   :  { %v1936_v57 = vperm.slane %v244_v51, %v1918_v40  ;;  %v260_v4 = vperm.slane %v254_v52, %v1918_v40  ;;  %v229_v9 = vrot.slane %v192_v53, 4  ;;  %v277_v14 = vrot.slane %v264_v58, 4 }
 0x117   :  { %v242_v56 = vsel %vm169_vm1, %v241_v50, %v200_v27  ;;  %v1940_v60 = vpop.permute.xlu2 %1670  ;;  %v129_v61 = vpop.permute.xlu1 %128 }
 0x118   :  { %v109_v1 = vpop.permute.xlu0 %108  ;;  %v248_v3 = vperm.slane %v242_v56, %v1918_v40  ;;  %v1673_v12 = vunpack.i.h.bf16 %v1940_v60  ;;  %v269_v13 = vrot.slane %v1936_v57, 4  ;;  %v1672_v21 = vunpack.i.l.bf16 %v1940_v60 }
 0x119   :  { %v168_v7 = vrot.slane %v109_v1, 4  ;;  %v172_v8 = vsel %vm169_vm1, %v109_v1, %v171_v55  ;;  %v273_v23 = vrot.slane %v260_v4, 4  ;;  %v375_v25 = vrot.slane %v129_v61, 4 }
 0x11a   :  { %v180_v11 = vperm.slane %v172_v8, %v1903_v18  ;;  %v265_v22 = vrot.slane %v248_v3, 4  ;;  %v1977_v36 = vrot.slane %v1672_v21, 4 }
 0x11b   :  { %v170_v16 = vsel %vm169_vm1, %v168_v7, %v1882_v5  ;;  %v1969_v5 = vrot.slane %v1673_v12, 4 }
 0x11c   :  { %v176_v17 = vperm.slane %v170_v16, %v1903_v18  ;;  %v230_v19 = vsel %vm169_vm1, %v229_v9, %v180_v11  ;;  %v231_v20 = vrot.slane %v180_v11, 4 }
 0x11d   :  { %v236_v24 = vperm.slane %v230_v19, %v1918_v40 }
 0x11e   :  { %v218_v26 = vsel %vm169_vm1, %v217_v15, %v176_v17  ;;  %v219_v27 = vrot.slane %v176_v17, 4  ;;  %v232_v28 = vsel %vm169_vm1, %v192_v53, %v231_v20 }
 0x11f   :  { %v224_v29 = vperm.slane %v218_v26, %v1918_v40  ;;  %v240_v31 = vperm.slane %v232_v28, %v1918_v40  ;;  %v274_v32 = vsel %vm169_vm1, %v273_v23, %v236_v24  ;;  %v275_v33 = vrot.slane %v236_v24, 4  ;;  %v141_v34 = vpop.permute.xlu1 %140 }
 0x120   :  { %v220_v35 = vsel %vm169_vm1, %v188_v59, %v219_v27  ;;  %v123_v37 = vpop.permute.xlu0 %122  ;;  %v373_v38 = vrot.slane %v141_v34, 4  ;;  %v376_v41 = vsel %vm169_vm1, %v141_v34, %v375_v25  ;;  %v531_v51 = vrot.slane %v274_v32, 4 }
 0x121   :  { %v228_v42 = vperm.slane %v220_v35, %v1918_v40  ;;  %v1982_v43 = vsel %vm169_vm1, %v265_v22, %v224_v29  ;;  %v267_v44 = vrot.slane %v224_v29, 4  ;;  %v1985_v45 = vsel %vm169_vm1, %v260_v4, %v275_v33 }
 0x122   :  { %v278_v47 = vsel %vm169_vm1, %v277_v14, %v240_v31  ;;  %v279_v48 = vrot.slane %v240_v31, 4  ;;  %v507_v50 = vrot.slane %v1982_v43, 4  ;;  %v543_v55 = vrot.slane %v1985_v45, 4 }
 0x123   :  { %v271_v52 = vrot.slane %v228_v42, 4  ;;  %v529_v53 = vrot.slane %v278_v47, 4  ;;  %v374_v56 = vsel %vm169_vm1, %v373_v38, %v129_v61  ;;  %v384_v4 = vperm.slane %v376_v41, %v1903_v18 }
 0x124   :  { %v1992_v59 = vsel %vm169_vm1, %v264_v58, %v279_v48  ;;  %v380_v1 = vperm.slane %v374_v56, %v1903_v18  ;;  %v1997_v7 = vsel %vm169_vm1, %v248_v3, %v267_v44  ;;  %v2002_v11 = vsel %vm169_vm1, %v269_v13, %v228_v42 }
 0x125   :  { %v530_v8 = vsel %vm169_vm1, %v529_v53, %v274_v32  ;;  %v541_v9 = vrot.slane %v1992_v59, 4  ;;  %v2006_v61 = vsel %vm169_vm1, %v1936_v57, %v271_v52  ;;  %v363_v14 = vrot.slane %v123_v37, 4 }
 0x126   :  { %v2009_v58 = vperm.slane %v530_v8, %v1903_v18  ;;  %v409_v15 = vrot.slane %v380_v1, 4  ;;  %v421_v16 = vrot.slane %v384_v4, 4  ;;  %v505_v19 = vrot.slane %v2002_v11, 4 }
 0x127   :  { %v2013_v3 = vsel %vm169_vm1, %v541_v9, %v1985_v45  ;;  %v111_v17 = vpop.permute.xlu1 %110  ;;  %v508_v13 = vsel %vm169_vm1, %v2002_v11, %v507_v50  ;;  %v519_v20 = vrot.slane %v1997_v7, 4  ;;  %v517_v25 = vrot.slane %v2006_v61, 4 }
 0x128   :  { %v135_v57 = vpop.permute.xlu0 %134  ;;  %v337_v22 = vrot.slane %v111_v17, 4  ;;  %v340_v23 = vsel %vm169_vm1, %v111_v17, %v339_v2  ;;  %v2023_v24 = vperm.slane %v508_v13, %v1903_v18  ;;  %v532_v33 = vsel %vm169_vm1, %v278_v47, %v531_v51 }
 0x129   :  { %v361_v26 = vrot.slane %v135_v57, 4  ;;  %v364_v27 = vsel %vm169_vm1, %v135_v57, %v363_v14  ;;  %v348_v28 = vperm.slane %v340_v23, %v1903_v18  ;;  %v520_v29 = vsel %vm169_vm1, %v2006_v61, %v519_v20 }
 0x12a   :  { %v372_v31 = vperm.slane %v364_v27, %v1903_v18  ;;  %v338_v32 = vsel %vm169_vm1, %v337_v22, %v1890_v6  ;;  %v2034_v2 = vperm.slane %v520_v29, %v1903_v18  ;;  %v2067_v57 = vperm.slane %v532_v33, %v1903_v18 }
 0x12b   :  { %v362_v34 = vsel %vm169_vm1, %v361_v26, %v123_v37  ;;  %v344_v35 = vperm.slane %v338_v32, %v1903_v18  ;;  %v398_v38 = vsel %vm169_vm1, %v397_v63, %v348_v28  ;;  %v399_v41 = vrot.slane %v348_v28, 4 }
 0x12c   :  { %v368_v42 = vperm.slane %v362_v34, %v1903_v18  ;;  %v422_v44 = vsel %vm169_vm1, %v421_v16, %v372_v31  ;;  %v423_v48 = vrot.slane %v372_v31, 4  ;;  %v404_v6 = vperm.slane %v398_v38, %v1918_v40 }
 0x12d   :  { %v428_v50 = vperm.slane %v422_v44, %v1918_v40  ;;  %v386_v37 = vsel %vm169_vm1, %v385_v62, %v344_v35  ;;  %v387_v47 = vrot.slane %v344_v35, 4  ;;  %v400_v51 = vsel %vm169_vm1, %v1916_v39, %v399_v41 }
 0x12e   :  { %v410_v63 = vsel %vm169_vm1, %v409_v15, %v368_v42  ;;  %v411_v52 = vrot.slane %v368_v42, 4  ;;  %v424_v53 = vsel %vm169_vm1, %v384_v4, %v423_v48  ;;  %v392_v56 = vperm.slane %v386_v37, %v1918_v40 }
 0x12f   :  { %v416_v8 = vperm.slane %v410_v63, %v1918_v40  ;;  %v432_v9 = vperm.slane %v424_v53, %v1918_v40  ;;  %v441_v14 = vrot.slane %v428_v50, 4  ;;  %v388_v16 = vsel %vm169_vm1, %v1924_v46, %v387_v47  ;;  %v1666_v48 = vpop.permute.xlu1 %1665 }
 0x130   :  { %v412_v62 = vsel %vm169_vm1, %v380_v1, %v411_v52  ;;  %v2060_v17 = vperm.slane %v388_v16, %v1918_v40  ;;  %v408_v39 = vperm.slane %v400_v51, %v1918_v40  ;;  %v435_v15 = vrot.slane %v392_v56, 4  ;;  %v1661_v31 = vpop.permute.xlu0 %1660 }
 0x131   :  { %v2064_v4 = vperm.slane %v412_v62, %v1918_v40  ;;  %v433_v13 = vrot.slane %v416_v8, 4  ;;  %v445_v20 = vrot.slane %v432_v9, 4  ;;  %v2073_v46 = vsel %vm169_vm1, %v441_v14, %v404_v6 }
 0x132   :  { %v2070_v22 = vsel %vm169_vm1, %v416_v8, %v435_v15  ;;  %v443_v1 = vrot.slane %v404_v6, 4  ;;  %v447_v23 = vrot.slane %v408_v39, 4  ;;  %v439_v28 = vrot.slane %v2060_v17, 4 }
 0x133   :  { %v437_v26 = vrot.slane %v2064_v4, 4  ;;  %v2077_v27 = vsel %vm169_vm1, %v433_v13, %v392_v56  ;;  %v2081_v29 = vsel %vm169_vm1, %v445_v20, %v408_v39  ;;  %v544_v35 = vsel %vm169_vm1, %v1992_v59, %v543_v55 }
 0x134   :  { %v2084_v32 = vsel %vm169_vm1, %v428_v50, %v443_v1  ;;  %v2087_v33 = vsel %vm169_vm1, %v432_v9, %v447_v23  ;;  %v695_v34 = vrot.slane %v2081_v29, 4  ;;  %v697_v38 = vrot.slane %v2073_v46, 4 }
 0x135   :  { %v707_v41 = vrot.slane %v2087_v33, 4  ;;  %v2097_v42 = vperm.slane %v544_v35, %v1903_v18  ;;  %v567_v44 = vrot.slane %v2023_v24, 4  ;;  %v591_v50 = vrot.slane %v2067_v57, 4 }
 0x136   :  { %v696_v6 = vsel %vm169_vm1, %v695_v34, %v2073_v46  ;;  %v1663_v45 = vunpack.i.h.bf16 %v1661_v31  ;;  %v1662_v37 = vunpack.i.l.bf16 %v1661_v31  ;;  %v709_v47 = vrot.slane %v2084_v32, 4 }
 0x137   :  { %v2104_v55 = vperm.slane %v696_v6, %v1903_v18  ;;  %v708_v59 = vsel %vm169_vm1, %v707_v41, %v2084_v32  ;;  %v568_v51 = vsel %vm169_vm1, %v2034_v2, %v567_v44  ;;  %v592_v52 = vsel %vm169_vm1, %v2097_v42, %v591_v50 }
 0x138   :  { %v2112_v63 = vperm.slane %v708_v59, %v1903_v18  ;;  %v463_v53 = vrot.slane %v1663_v45, 4  ;;  %v1668_v56 = vunpack.i.h.bf16 %v1666_v48  ;;  %v2117_v8 = vperm.slane %v568_v51, %v1918_v40 }
 0x139   :  { %v2120_v9 = vperm.slane %v592_v52, %v1918_v40  ;;  %v294_v14 = vsel %vm169_vm1, %v1977_v36, %v1662_v37  ;;  %v295_v16 = vrot.slane %v1662_v37, 4  ;;  %v745_v62 = vrot.slane %v2104_v55, 4 }
 0x13a   :  { %v300_v39 = vperm.slane %v294_v14, %v1903_v18  ;;  %v462_v15 = vsel %vm169_vm1, %v1969_v5, %v1663_v45  ;;  %v464_v13 = vsel %vm169_vm1, %v1673_v12, %v463_v53  ;;  %v743_v31 = vrot.slane %v2112_v63, 4 }
 0x13b   :  { %v613_v20 = vrot.slane %v2120_v9, 4  ;;  %v296_v1 = vsel %vm169_vm1, %v1672_v21, %v295_v16  ;;  %v468_v36 = vperm.slane %v462_v15, %v1903_v18  ;;  %v472_v23 = vperm.slane %v464_v13, %v1903_v18 }
 0x13c   :  { %v304_v34 = vperm.slane %v296_v1, %v1903_v18  ;;  %v449_v35 = vrot.slane %v1668_v56, 4  ;;  %v452_v5 = vsel %vm169_vm1, %v1668_v56, %v1946_v0  ;;  %v305_v6 = vrot.slane %v300_v39, 4 }
 0x13d   :  { %v614_v12 = vsel %vm169_vm1, %v613_v20, %v2117_v8  ;;  %v473_v41 = vrot.slane %v468_v36, 4  ;;  %v485_v44 = vrot.slane %v472_v23, 4  ;;  %v460_v60 = vperm.slane %v452_v5, %v1903_v18 }
 0x13e   :  { %v855_v21 = vpack.c.bf16 %v614_v12, %v614_v12  ;;  %v450_v50 = vsel %vm169_vm1, %v449_v35, %v1658_v49  ;;  %v1667_v45 = vunpack.i.l.bf16 %v1666_v48  ;;  %v317_v37 = vrot.slane %v304_v34, 4 }
 0x13f   :  { %v456_v59 = vperm.slane %v450_v50, %v1903_v18  ;;  %v486_v51 = vsel %vm169_vm1, %v485_v44, %v460_v60  ;;  %v487_v0 = vrot.slane %v460_v60, 4 }
 0x140   :  { %v912_v52 = vsel %vm869_vm2, %v855_v21, 0  ;;  %v492_v53 = vperm.slane %v486_v51, %v1918_v40  ;;  %v281_v56 = vrot.slane %v1667_v45, 4  ;;  %v284_v14 = vsel %vm169_vm1, %v1667_v45, %v1954_v10 }
 0x141   :  { %921 = vmatpush.bf16.xpose.msra.mxu3 %v912_v52  ;;  %v474_v16 = vsel %vm169_vm1, %v473_v41, %v456_v59  ;;  %v475_v15 = vrot.slane %v456_v59, 4  ;;  %v488_v49 = vsel %vm169_vm1, %v472_v23, %v487_v0  ;;  %v292_v48 = vperm.slane %v284_v14, %v1903_v18 }
 0x142   :  { %v2157_v13 = vperm.slane %v474_v16, %v1918_v40  ;;  %v496_v20 = vperm.slane %v488_v49, %v1918_v40  ;;  %v501_v1 = vrot.slane %v492_v53, 4  ;;  %v282_v35 = vsel %vm169_vm1, %v281_v56, %v1657_v54 }
 0x143   :  { %v476_v10 = vsel %vm169_vm1, %v468_v36, %v475_v15  ;;  %v288_v5 = vperm.slane %v282_v35, %v1903_v18  ;;  %v318_v12 = vsel %vm169_vm1, %v317_v37, %v292_v48  ;;  %v319_v41 = vrot.slane %v292_v48, 4 }
 0x144   :  { %v484_v23 = vperm.slane %v476_v10, %v1918_v40  ;;  %v497_v44 = vrot.slane %v2157_v13, 4  ;;  %v503_v60 = vrot.slane %v496_v20, 4  ;;  %v565_v21 = vrot.slane %v2034_v2, 4 }
 0x145   :  { %v306_v50 = vsel %vm169_vm1, %v305_v6, %v288_v5  ;;  %v307_v45 = vrot.slane %v288_v5, 4  ;;  %v320_v30 = vsel %vm169_vm1, %v304_v34, %v319_v41  ;;  %v324_v54 = vperm.slane %v318_v12, %v1918_v40 }
 0x146   :  { %v2172_v36 = vrot.slane %v484_v23, 4  ;;  %v2175_v59 = vsel %vm169_vm1, 0.0, %v501_v1  ;;  %v2178_v37 = vsel %vm169_vm1, 0.0, %v503_v60  ;;  %v794_v51 = vsel %vm169_vm1, %v503_v60, %v492_v53 }
 0x147   :  { %v2182_v0 = vsel %vm169_vm1, 0.0, %v497_v44  ;;  %v2185_v2 = vperm.slane %v794_v51, %v1903_v18  ;;  %v308_v34 = vsel %vm169_vm1, %v300_v39, %v307_v45  ;;  %v2189_v6 = vperm.slane %v306_v50, %v1918_v40 }
 0x148   :  { %v799_v52 = vrot.slane %v2178_v37, 4  ;;  %v316_v56 = vperm.slane %v308_v34, %v1918_v40  ;;  %v328_v14 = vperm.slane %v320_v30, %v1918_v40  ;;  %v333_v16 = vrot.slane %v324_v54, 4 }
 0x149   :  { %v2196_v53 = vsel %vm169_vm1, 0.0, %v2172_v36  ;;  %v329_v15 = vrot.slane %v2189_v6, 4  ;;  %v566_v49 = vsel %vm169_vm1, %v565_v21, %v2023_v24  ;;  %v589_v39 = vrot.slane %v2097_v42, 4 }
 0x14a   :  { %v2202_v48 = vrot.slane %v316_v56, 4  ;;  %v2205_v20 = vsel %vm169_vm1, 0.0, %v333_v16  ;;  %v335_v1 = vrot.slane %v328_v14, 4  ;;  %v572_v35 = vperm.slane %v566_v49, %v1918_v40 }
 0x14b   :  { %v2209_v10 = vsel %vm169_vm1, 0.0, %v329_v15  ;;  %v590_v5 = vsel %vm169_vm1, %v589_v39, %v2067_v57  ;;  %v615_v12 = vrot.slane %v2117_v8, 4  ;;  %v506_v24 = vsel %vm169_vm1, %v505_v19, %v1982_v43 }
 0x14c   :  { %v2220_v42 = vsel %vm169_vm1, 0.0, %v2202_v48  ;;  %v2223_v41 = vsel %vm169_vm1, 0.0, %v335_v1  ;;  %v628_v23 = vsel %vm169_vm1, %v335_v1, %v324_v54  ;;  %v596_v44 = vperm.slane %v590_v5, %v1918_v40 }
 0x14d   :  { %v622_v57 = vrot.slane %v2220_v42, 4  ;;  %v2229_v8 = vperm.slane %v628_v23, %v1903_v18  ;;  %v633_v11 = vrot.slane %v2223_v41, 4  ;;  %v616_v43 = vsel %vm169_vm1, %v2120_v9, %v615_v12 }
 0x14e   :  { %v609_v19 = vrot.slane %v596_v44, 4  ;;  %v856_v60 = vpack.c.bf16 %v616_v43, %v616_v43  ;;  %v611_v21 = vrot.slane %v572_v35, 4  ;;  %v512_v50 = vperm.slane %v506_v24, %v1903_v18 }
 0x14f   :  { %v518_v45 = vsel %vm169_vm1, %v517_v25, %v1997_v7  ;;  %v548_v30 = vperm.slane %v2013_v3, %v1903_v18  ;;  %v579_v54 = vrot.slane %v2009_v58, 4  ;;  %v438_v9 = vsel %vm169_vm1, %v437_v26, %v2060_v17 }
 0x150   :  { %v610_v51 = vsel %vm169_vm1, %v609_v19, %v572_v35  ;;  %v931_v34 = vsel %vm869_vm2, %v856_v60, 0  ;;  %v612_v56 = vsel %vm169_vm1, %v596_v44, %v611_v21  ;;  %v524_v61 = vperm.slane %v518_v45, %v1903_v18 }
 0x151   :  { %v853_v14 = vpack.c.bf16 %v610_v51, %v610_v51  ;;  %940 = vmatpush.bf16.xpose.msrb.mxu0 %v931_v34  ;;  %v854_v7 = vpack.c.bf16 %v612_v56, %v612_v56  ;;  %v555_v25 = vrot.slane %v512_v50, 4  ;;  %v580_v3 = vsel %vm169_vm1, %v548_v30, %v579_v54 }
 0x152   :  { %v588_v16 = vperm.slane %v580_v3, %v1918_v40  ;;  %v553_v15 = vrot.slane %v524_v61, 4  ;;  %v577_v49 = vrot.slane %v548_v30, 4  ;;  %v440_v26 = vsel %vm169_vm1, %v2064_v4, %v439_v28 }
 0x153   :  { %v874_v39 = vsel %vm869_vm2, %v853_v14, 0  ;;  %v893_v1 = vsel %vm869_vm2, %v854_v7, 0  ;;  %v556_v35 = vsel %vm169_vm1, %v524_v61, %v555_v25  ;;  %v671_v5 = vrot.slane %v438_v9, 4 }
 0x154   :  { %883 = vmatpush.bf16.xpose.msra.mxu1 %v874_v39  ;;  %902 = vmatpush.bf16.xpose.msra.mxu2 %v893_v1  ;;  %v564_v12 = vperm.slane %v556_v35, %v1918_v40  ;;  %v605_v24 = vrot.slane %v588_v16, 4  ;;  %v554_v23 = vsel %vm169_vm1, %v553_v15, %v512_v50  ;;  %v578_v17 = vsel %vm169_vm1, %v577_v49, %v2009_v58 }
 0x155   :  { %v560_v44 = vperm.slane %v554_v23, %v1918_v40  ;;  %v584_v4 = vperm.slane %v578_v17, %v1918_v40  ;;  %v673_v28 = vrot.slane %v2077_v27, 4  ;;  %v683_v43 = vrot.slane %v440_v26, 4 }
 0x156   :  { %v606_v19 = vsel %vm169_vm1, %v605_v24, %v564_v12  ;;  %v607_v60 = vrot.slane %v564_v12, 4  ;;  %v685_v21 = vrot.slane %v2070_v22, 4  ;;  %v698_v50 = vsel %vm169_vm1, %v2081_v29, %v697_v38 }
 0x157   :  { %v839_v45 = vmul.f32 0.35355338, %v606_v19  ;;  %v601_v30 = vrot.slane %v584_v4, 4  ;;  %v603_v58 = vrot.slane %v560_v44, 4  ;;  %v674_v54 = vsel %vm169_vm1, %v438_v9, %v673_v28 }
 0x158   :  { %v608_v51 = vsel %vm169_vm1, %v588_v16, %v607_v60  ;;  %v682_v34 = vperm.slane %v674_v54, %v1903_v18  ;;  %v686_v56 = vsel %vm169_vm1, %v440_v26, %v685_v21  ;;  %v706_v61 = vperm.slane %v698_v50, %v1903_v18 }
 0x159   :  { %v847_v14 = vpack.c.bf16 %v839_v45, %v839_v45  ;;  %v602_v7 = vsel %vm169_vm1, %v601_v30, %v560_v44  ;;  %v840_v46 = vmul.f32 0.35355338, %v608_v51  ;;  %v604_v25 = vsel %vm169_vm1, %v584_v4, %v603_v58 }
 0x15a   :  { %v837_v29 = vmul.f32 0.35355338, %v602_v7  ;;  %v838_v38 = vmul.f32 0.35355338, %v604_v25  ;;  %v694_v3 = vperm.slane %v686_v56, %v1903_v18  ;;  %v710_v9 = vsel %vm169_vm1, %v2087_v33, %v709_v47 }
 0x15b   :  { %1605 = vmatmul.msk.bf16.vlgmr.msra.gmra.mxu3 %vm869_vm2, %v847_v14  ;;  %v848_v16 = vpack.c.bf16 %v840_v46, %v840_v46  ;;  %v718_v15 = vperm.slane %v710_v9, %v1903_v18  ;;  %v733_v49 = vrot.slane %v682_v34, 4  ;;  %v757_v26 = vrot.slane %v706_v61, 4 }
 0x15c   :  { %v845_v39 = vpack.c.bf16 %v837_v29, %v837_v29  ;;  %v846_v1 = vpack.c.bf16 %v838_v38, %v838_v38  ;;  %v731_v35 = vrot.slane %v694_v3, 4  ;;  %v672_v12 = vsel %vm169_vm1, %v671_v5, %v2077_v27 }
 0x15d   :  { %1606 = vmatmul.msk.bf16.vlgmr.msrb.gmra.mxu0 %vm869_vm2, %v848_v16  ;;  %v755_v24 = vrot.slane %v718_v15, 4  ;;  %v734_v32 = vsel %vm169_vm1, %v694_v3, %v733_v49  ;;  %v758_v33 = vsel %vm169_vm1, %v718_v15, %v757_v26  ;;  %v678_v47 = vperm.slane %v672_v12, %v1903_v18 }
 0x15e   :  { %1603 = vmatmul.msk.bf16.vlgmr.msra.gmra.mxu1 %vm869_vm2, %v845_v39  ;;  %1604 = vmatmul.msk.bf16.vlgmr.msra.gmra.mxu2 %vm869_vm2, %v846_v1  ;;  %v732_v23 = vsel %vm169_vm1, %v731_v35, %v682_v34  ;;  %v742_v17 = vperm.slane %v734_v32, %v1918_v40  ;;  %v766_v44 = vperm.slane %v758_v33, %v1918_v40  ;;  %v653_v27 = vrot.slane %v2229_v8, 4 }
 0x15f   :  { %v738_v5 = vperm.slane %v732_v23, %v1918_v40  ;;  %v756_v4 = vsel %vm169_vm1, %v755_v24, %v706_v61  ;;  %v684_v28 = vsel %vm169_vm1, %v683_v43, %v2070_v22  ;;  %v744_v19 = vsel %vm169_vm1, %v743_v31, %v2104_v55 }
 0x160   :  { %v762_v60 = vperm.slane %v756_v4, %v1918_v40  ;;  %v779_v21 = vrot.slane %v766_v44, 4  ;;  %v781_v50 = vrot.slane %v742_v17, 4  ;;  %v690_v45 = vperm.slane %v684_v28, %v1903_v18 }
 0x161   :  { %v777_v30 = vrot.slane %v738_v5, 4  ;;  %v750_v58 = vperm.slane %v744_v19, %v1918_v40  ;;  %v721_v54 = vrot.slane %v678_v47, 4  ;;  %v746_v22 = vsel %vm169_vm1, %v2112_v63, %v745_v62 }
 0x162   :  { %v775_v43 = vrot.slane %v762_v60, 4  ;;  %v780_v51 = vsel %vm169_vm1, %v779_v21, %v742_v17  ;;  %v782_v31 = vsel %vm169_vm1, %v766_v44, %v781_v50  ;;  %v719_v34 = vrot.slane %v690_v45, 4 }
 0x163   :  { %v859_v56 = vpack.c.bf16 %v780_v51, %v780_v51  ;;  %v778_v61 = vsel %vm169_vm1, %v762_v60, %v777_v30  ;;  %v860_v14 = vpack.c.bf16 %v782_v31, %v782_v31  ;;  %v767_v7 = vrot.slane %v750_v58, 4 }
 0x164   :  { %v776_v46 = vsel %vm169_vm1, %v775_v43, %v738_v5  ;;  %v858_v25 = vpack.c.bf16 %v778_v61, %v778_v61  ;;  %v720_v29 = vsel %vm169_vm1, %v719_v34, %v678_v47  ;;  %v722_v55 = vsel %vm169_vm1, %v690_v45, %v721_v54 }
 0x165   :  { %v857_v38 = vpack.c.bf16 %v776_v46, %v776_v46  ;;  %v988_v63 = vsel %vm869_vm2, %v859_v56, 0  ;;  %v1007_v62 = vsel %vm869_vm2, %v860_v14, 0  ;;  %v726_v3 = vperm.slane %v720_v29, %v1918_v40 }
 0x166   :  { %997 = vmatpush.bf16.xpose.msrb.mxu3 %v988_v63  ;;  %v969_v9 = vsel %vm869_vm2, %v858_v25, 0  ;;  %1016 = vmatpush.bf16.xpose.msra.mxu0 %v1007_v62  ;;  %v730_v16 = vperm.slane %v722_v55, %v1918_v40  ;;  %v754_v15 = vperm.slane %v746_v22, %v1918_v40  ;;  %v617_v49 = vsel %vm169_vm1, %v2202_v48, %v2189_v6 }
 0x167   :  { %v950_v26 = vsel %vm869_vm2, %v857_v38, 0  ;;  %978 = vmatpush.bf16.xpose.msrb.mxu2 %v969_v9  ;;  %v768_v39 = vsel %vm169_vm1, %v767_v7, %v726_v3  ;;  %v769_v1 = vrot.slane %v726_v3, 4  ;;  %v621_v35 = vperm.slane %v617_v49, %v1903_v18 }
 0x168   :  { %959 = vmatpush.bf16.xpose.msrb.mxu1 %v950_v26  ;;  %v841_v12 = vmul.f32 0.35355338, %v768_v39  ;;  %v771_v24 = vrot.slane %v754_v15, 4  ;;  %v773_v32 = vrot.slane %v730_v16, 4  ;;  %v623_v33 = vsel %vm169_vm1, %v622_v57, %v2209_v10 }
 0x169   :  { %v770_v47 = vsel %vm169_vm1, %v750_v58, %v769_v1  ;;  %v627_v6 = vperm.slane %v623_v33, %v1903_v18  ;;  %v634_v48 = vsel %vm169_vm1, %v633_v11, %v2205_v20  ;;  %v641_v23 = vrot.slane %v621_v35, 4 }
 0x16a   :  { %v788_v17 = vrot.slane %v2196_v53, 4  ;;  %v772_v44 = vsel %vm169_vm1, %v771_v24, %v730_v16  ;;  %v842_v5 = vmul.f32 0.35355338, %v770_v47  ;;  %v774_v4 = vsel %vm169_vm1, %v754_v15, %v773_v32 }
 0x16b   :  { %v843_v42 = vmul.f32 0.35355338, %v772_v44  ;;  %v844_v28 = vmul.f32 0.35355338, %v774_v4  ;;  %v638_v10 = vperm.slane %v634_v48, %v1903_v18  ;;  %v642_v57 = vsel %vm169_vm1, %v627_v6, %v641_v23 }
 0x16c   :  { %v849_v19 = vpack.c.bf16 %v841_v12, %v841_v12  ;;  %v850_v60 = vpack.c.bf16 %v842_v5, %v842_v5  ;;  %v650_v41 = vperm.slane %v642_v57, %v1918_v40  ;;  %v783_v20 = vsel %vm169_vm1, %v2172_v36, %v2157_v13 }
 0x16d   :  { %v851_v53 = vpack.c.bf16 %v843_v42, %v843_v42  ;;  %v852_v11 = vpack.c.bf16 %v844_v28, %v844_v28  ;;  %v654_v21 = vsel %vm169_vm1, %v638_v10, %v653_v27  ;;  %v787_v50 = vperm.slane %v783_v20, %v1903_v18 }
 0x16e   :  { %1608 = vmatmul.msk.bf16.vlgmr.msrb.gmra.mxu2 %vm869_vm2, %v850_v60  ;;  %v662_v45 = vperm.slane %v654_v21, %v1918_v40  ;;  %v789_v30 = vsel %vm169_vm1, %v788_v17, %v2182_v0  ;;  %v800_v13 = vsel %vm169_vm1, %v799_v52, %v2175_v59  ;;  %v819_v36 = vrot.slane %v2185_v2, 4 }
 0x16f   :  { %1607 = vmatmul.msk.bf16.vlgmr.msrb.gmra.mxu1 %vm869_vm2, %v849_v19  ;;  %1609 = vmatmul.msk.bf16.vlgmr.msrb.gmra.mxu3 %vm869_vm2, %v851_v53  ;;  %v793_v27 = vperm.slane %v789_v30, %v1903_v18  ;;  %v804_v58 = vperm.slane %v800_v13, %v1903_v18  ;;  %v807_v54 = vrot.slane %v787_v50, 4  ;;  %v639_v22 = vrot.slane %v627_v6, 4 }
 0x170   :  { %1610 = vmatmul.msk.bf16.vlgmr.msra.gmra.mxu0 %vm869_vm2, %v852_v11  ;;  %v667_v0 = vrot.slane %v662_v45, 4  ;;  %v651_v43 = vrot.slane %v638_v10, 4  ;;  %v669_v37 = vrot.slane %v650_v41, 4  ;;  %v1022_v60 = vlaneseq }
 0x171   :  { %v808_v59 = vsel %vm169_vm1, %v793_v27, %v807_v54  ;;  %v820_v52 = vsel %vm169_vm1, %v804_v58, %v819_v36  ;;  %v640_v51 = vsel %vm169_vm1, %v639_v22, %v621_v35  ;;  %v805_v31 = vrot.slane %v793_v27, 4 }
 0x172   :  { %v668_v34 = vsel %vm169_vm1, %v667_v0, %v650_v41  ;;  %v816_v56 = vperm.slane %v808_v59, %v1918_v40  ;;  %v828_v61 = vperm.slane %v820_v52, %v1918_v40  ;;  %v646_v14 = vperm.slane %v640_v51, %v1918_v40 }
 0x173   :  { %v863_v7 = vpack.c.bf16 %v668_v34, %v668_v34  ;;  %v652_v46 = vsel %vm169_vm1, %v651_v43, %v2229_v8  ;;  %v670_v25 = vsel %vm169_vm1, %v662_v45, %v669_v37  ;;  %v806_v29 = vsel %vm169_vm1, %v805_v31, %v787_v50 }
 0x174   :  { %v833_v55 = vrot.slane %v828_v61, 4  ;;  %v658_v38 = vperm.slane %v652_v46, %v1918_v40  ;;  %v864_v63 = vpack.c.bf16 %v670_v25, %v670_v25  ;;  %v812_v62 = vperm.slane %v806_v29, %v1918_v40 }
 0x175   :  { %v1160_v3 = vsel %vm1120_vm3, %v863_v7, 0  ;;  %v817_v9 = vrot.slane %v804_v58, 4  ;;  %v835_v16 = vrot.slane %v816_v56, 4  ;;  %v665_v15 = vrot.slane %v646_v14, 4 }
 0x176   :  { %1169 = vmatpush.bf16.msra.mxu3 %v1160_v3  ;;  %v834_v49 = vsel %vm169_vm1, %v833_v55, %v816_v56  ;;  %v663_v26 = vrot.slane %v658_v38, 4  ;;  %v1179_v8 = vsel %vm1120_vm3, %v864_v63, 0  ;;  %v831_v39 = vrot.slane %v812_v62, 4 }
 0x177   :  { %v867_v1 = vpack.c.bf16 %v834_v49, %v834_v49  ;;  %1188 = vmatpush.bf16.msrb.mxu0 %v1179_v8  ;;  %v818_v35 = vsel %vm169_vm1, %v817_v9, %v2185_v2  ;;  %v836_v12 = vsel %vm169_vm1, %v828_v61, %v835_v16  ;;  %v666_v24 = vsel %vm169_vm1, %v658_v38, %v665_v15 }
 0x178   :  { %v664_v32 = vsel %vm169_vm1, %v663_v26, %v646_v14  ;;  %v824_v33 = vperm.slane %v818_v35, %v1918_v40  ;;  %v868_v47 = vpack.c.bf16 %v836_v12, %v836_v12  ;;  %v862_v6 = vpack.c.bf16 %v666_v24, %v666_v24 }
 0x179   :  { %v1236_v48 = vsel %vm1120_vm3, %v867_v1, 0  ;;  %v861_v23 = vpack.c.bf16 %v664_v32, %v664_v32  ;;  %v1023_v41 = vshrl.u32 %v1022_v60, 7  ;;  %v1025_v20 = vand.u32 127, %v1022_v60 }
 0x17a   :  { %1245 = vmatpush.bf16.msrb.mxu3 %v1236_v48  ;;  %v829_v17 = vrot.slane %v824_v33, 4  ;;  %v1255_v44 = vsel %vm1120_vm3, %v868_v47, 0  ;;  %v1141_v5 = vsel %vm1120_vm3, %v862_v6, 0  ;;  %v832_v2 = vsel %vm169_vm1, %v824_v33, %v831_v39 }
 0x17b   :  { %v1122_v4 = vsel %vm1120_vm3, %v861_v23, 0  ;;  %1264 = vmatpush.bf16.msra.mxu0 %v1255_v44  ;;  %1150 = vmatpush.bf16.msra.mxu2 %v1141_v5  ;;  %v866_v42 = vpack.c.bf16 %v832_v2, %v832_v2  ;;  %vm2398_vm4 = vcmp.le.s32.totalorder %v1025_v20, %v1023_v41 }
 0x17c   :  { %1131 = vmatpush.bf16.msra.mxu1 %v1122_v4  ;;  %v830_v28 = vsel %vm169_vm1, %v829_v17, %v812_v62 }
 0x17d   :  { %v865_v10 = vpack.c.bf16 %v830_v28, %v830_v28  ;;  %v1217_v57 = vsel %vm1120_vm3, %v866_v42, 0 }
 0x17f   :  { %1226 = vmatpush.bf16.msrb.mxu2 %v1217_v57  ;;  %v1198_v19 = vsel %vm1120_vm3, %v865_v10, 0 }
 0x180   :  { %1207 = vmatpush.bf16.msrb.mxu1 %v1198_v19 }
 0x1da   :  { %v942_v11 = vpop.f32.mrf.mxu0 }
 0x1db   :  { %v885_v21 = vpop.f32.mrf.mxu1  ;;  %v1032_v58 = vsel %vm2398_vm4, %v942_v11, -1e+30 }
 0x1dc   :  { %v1029_v50 = vsel %vm2398_vm4, %v885_v21, -1e+30  ;;  %v1046_v37 = vsel %vm869_vm2, %v1032_v58, -inf }
 0x1dd   :  { %v1037_v45 = vsel %vm869_vm2, %v1029_v50, -inf }
 0x1de   :  { %1038 = vmax.xlane.f32.xlu2 %v1037_v45  ;;  %v923_v30 = vpop.f32.mrf.mxu3 }
 0x1df   :  { %v1031_v13 = vsel %vm2398_vm4, %v923_v30, -1e+30 }
 0x1e0   :  { %v1043_v36 = vsel %vm869_vm2, %v1031_v13, -inf }
 0x1e1   :  { %1044 = vmax.xlane.f32.xlu0 %v1043_v36  ;;  %v904_v27 = vpop.f32.mrf.mxu2 }
 0x1e2   :  { %v1030_v54 = vsel %vm2398_vm4, %v904_v27, -1e+30  ;;  %v944_v22 = vpop.f32.mrf.mxu0 }
 0x1e3   :  { %v887_v0 = vpop.f32.mrf.mxu1  ;;  %v1040_v43 = vsel %vm869_vm2, %v1030_v54, -inf }
 0x1e4   :  { %1041 = vmax.xlane.f32.xlu1 %v1040_v43 }
 0x1e6   :  { %1047 = vmax.xlane.f32.xlu2 %v1046_v37  ;;  %v925_v59 = vpop.f32.mrf.mxu3 }
 0x1e9   :  { %v906_v52 = vpop.f32.mrf.mxu2 }
 0x1ec   :  { %v961_v51 = vpop.f32.mrf.mxu1 }
 0x1ed   :  { %v1033_v31 = vsel %vm2398_vm4, %v961_v51, -1e+30  ;;  %v1018_v34 = vpop.f32.mrf.mxu0 }
 0x1ee   :  { %v1049_v56 = vsel %vm869_vm2, %v1033_v31, -inf  ;;  %v1036_v63 = vsel %vm2398_vm4, %v1018_v34, -1e+30 }
 0x1ef   :  { %1050 = vmax.xlane.f32.xlu2 %v1049_v56  ;;  %v1058_v9 = vsel %vm869_vm2, %v1036_v63, -inf }
 0x1f1   :  { %v980_v61 = vpop.f32.mrf.mxu2 }
 0x1f2   :  { %v999_v14 = vpop.f32.mrf.mxu3  ;;  %v1034_v7 = vsel %vm2398_vm4, %v980_v61, -1e+30 }
 0x1f3   :  { %v1035_v46 = vsel %vm2398_vm4, %v999_v14, -1e+30  ;;  %v1052_v25 = vsel %vm869_vm2, %v1034_v7, -inf }
 0x1f4   :  { %v963_v29 = vpop.f32.mrf.mxu1  ;;  %v1055_v55 = vsel %vm869_vm2, %v1035_v46, -inf  ;;  %1053 = vmax.xlane.f32.xlu1 %v1052_v25 }
 0x1f5   :  { %1056 = vmax.xlane.f32.xlu0 %v1055_v55  ;;  %v1020_v38 = vpop.f32.mrf.mxu0 }
 0x1f9   :  { %v982_v62 = vpop.f32.mrf.mxu2 }
 0x1fa   :  { %v1001_v3 = vpop.f32.mrf.mxu3 }
 0x1fd   :  { %1059 = vmax.xlane.f32.xlu0 %v1058_v9 }
 0x251   :  { %v1039_v16 = vpop.xlane.xlu2 %1038 }
 0x252   :  { %v1061_v15 = vsub.f32 %v1029_v50, %v1039_v16 }
 0x254   :  { %v1069_v49 = vmul.f32 1.442695, %v1061_v15  ;;  %v1045_v26 = vpop.xlane.xlu0 %1044 }
 0x255   :  { %v1063_v8 = vsub.f32 %v1031_v13, %v1045_v26 }
 0x256   :  { %1689 = vpow2.f32 %v1069_v49 }
 0x257   :  { %v1073_v39 = vmul.f32 1.442695, %v1063_v8  ;;  %v1042_v1 = vpop.xlane.xlu1 %1041 }
 0x258   :  { %v1062_v35 = vsub.f32 %v1030_v54, %v1042_v1 }
 0x259   :  { %1691 = vpow2.f32 %v1073_v39  ;;  %v1048_v12 = vpop.xlane.xlu2 %1047 }
 0x25a   :  { %v1071_v24 = vmul.f32 1.442695, %v1062_v35  ;;  %v1064_v32 = vsub.f32 %v1032_v58, %v1048_v12 }
 0x25c   :  { %v1690_v33 = vpop.eup %1689  ;;  %1693 = vpow2.f32 %v1071_v24  ;;  %v1075_v47 = vmul.f32 1.442695, %v1064_v32 }
 0x25d   :  { %v1109_v6 = vpack.c.bf16 %v1690_v33, %v1690_v33  ;;  %v1085_v48 = vsel %vm869_vm2, %v1690_v33, 0.0 }
 0x25e   :  { %1695 = vpow2.f32 %v1075_v47  ;;  %1086 = vadd.xlane.f32.xlu0 %v1085_v48 }
 0x25f   :  { %v1692_v23 = vpop.eup %1691  ;;  %1611 = vmatmul.msk.bf16.vlgmr.msra.gmra.mxu1 %vm869_vm2, %v1109_v6 }
 0x260   :  { %v1111_v17 = vpack.c.bf16 %v1692_v23, %v1692_v23  ;;  %v1091_v50 = vsel %vm869_vm2, %v1692_v23, 0.0 }
 0x262   :  { %v1694_v44 = vpop.eup %1693  ;;  %v1051_v5 = vpop.xlane.xlu2 %1050  ;;  %1613 = vmatmul.msk.bf16.vlgmr.msra.gmra.mxu3 %vm869_vm2, %v1111_v17 }
 0x263   :  { %v1110_v2 = vpack.c.bf16 %v1694_v44, %v1694_v44  ;;  %v1065_v4 = vsub.f32 %v1033_v31, %v1051_v5  ;;  %v1088_v43 = vsel %vm869_vm2, %v1694_v44, 0.0 }
 0x264   :  { %v1696_v42 = vpop.eup %1695 }
 0x265   :  { %v1112_v28 = vpack.c.bf16 %v1696_v42, %v1696_v42  ;;  %v1077_v10 = vmul.f32 1.442695, %v1065_v4  ;;  %v1094_v57 = vsel %vm869_vm2, %v1696_v42, 0.0  ;;  %1612 = vmatmul.msk.bf16.vlgmr.msra.gmra.mxu2 %vm869_vm2, %v1110_v2 }
 0x266   :  { %1095 = vadd.xlane.f32.xlu1 %v1094_v57 }
 0x267   :  { %1697 = vpow2.f32 %v1077_v10  ;;  %1614 = vmatmul.msk.bf16.vlgmr.msrb.gmra.mxu0 %vm869_vm2, %v1112_v28  ;;  %v1054_v19 = vpop.xlane.xlu1 %1053 }
 0x268   :  { %v1057_v60 = vpop.xlane.xlu0 %1056  ;;  %v1066_v41 = vsub.f32 %v1034_v7, %v1054_v19 }
 0x269   :  { %v1067_v20 = vsub.f32 %v1035_v46, %v1057_v60 }
 0x26a   :  { %v1079_v53 = vmul.f32 1.442695, %v1066_v41 }
 0x26b   :  { %v1081_v11 = vmul.f32 1.442695, %v1067_v20 }
 0x26c   :  { %1699 = vpow2.f32 %v1079_v53 }
 0x26d   :  { %v1698_v21 = vpop.eup %1697  ;;  %1701 = vpow2.f32 %v1081_v11 }
 0x26e   :  { %v1113_v45 = vpack.c.bf16 %v1698_v21, %v1698_v21  ;;  %1092 = vadd.xlane.f32.xlu1 %v1091_v50  ;;  %v1097_v30 = vsel %vm869_vm2, %v1698_v21, 0.0 }
 0x26f   :  { %1098 = vadd.xlane.f32.xlu2 %v1097_v30 }
 0x270   :  { %v1060_v13 = vpop.xlane.xlu0 %1059  ;;  %1615 = vmatmul.msk.bf16.vlgmr.msrb.gmra.mxu1 %vm869_vm2, %v1113_v45 }
 0x271   :  { %v1068_v36 = vsub.f32 %v1036_v63, %v1060_v13 }
 0x272   :  { %v1700_v27 = vpop.eup %1699 }
 0x273   :  { %v1702_v58 = vpop.eup %1701  ;;  %v1114_v54 = vpack.c.bf16 %v1700_v27, %v1700_v27  ;;  %v1083_v22 = vmul.f32 1.442695, %v1068_v36  ;;  %v1100_v31 = vsel %vm869_vm2, %v1700_v27, 0.0 }
 0x274   :  { %v1115_v0 = vpack.c.bf16 %v1702_v58, %v1702_v58  ;;  %v1103_v37 = vsel %vm869_vm2, %v1702_v58, 0.0 }
 0x275   :  { %1703 = vpow2.f32 %v1083_v22  ;;  %1616 = vmatmul.msk.bf16.vlgmr.msrb.gmra.mxu2 %vm869_vm2, %v1114_v54 }
 0x276   :  { %1617 = vmatmul.msk.bf16.vlgmr.msrb.gmra.mxu3 %vm869_vm2, %v1115_v0  ;;  %1089 = vadd.xlane.f32.xlu1 %v1088_v43 }
 0x277   :  { %1104 = vadd.xlane.f32.xlu2 %v1103_v37 }
 0x27b   :  { %v1704_v59 = vpop.eup %1703 }
 0x27c   :  { %v1116_v52 = vpack.c.bf16 %v1704_v59, %v1704_v59  ;;  %v1106_v51 = vsel %vm869_vm2, %v1704_v59, 0.0 }
 0x27d   :  { %1107 = vadd.xlane.f32.xlu0 %v1106_v51 }
 0x27e   :  { %1618 = vmatmul.msk.bf16.vlgmr.msra.gmra.mxu0 %vm869_vm2, %v1116_v52 }
 0x27f   :  { %1101 = vadd.xlane.f32.xlu2 %v1100_v31 }
 0x2d1   :  { %v1087_v61 = vpop.xlane.xlu0 %1086 }
 0x2d2   :  { %1705 = vrcp.f32 %v1087_v61 }
 0x2d8   :  { %v1706_v55 = vpop.eup %1705 }
 0x2d9   :  { %v1096_v34 = vpop.xlane.xlu1 %1095 }
 0x2dc   :  { %v1133_v56 = vpop.f32.mrf.mxu1 }
 0x2dd   :  { %v1278_v63 = vmul.f32 %v1706_v55, %v1133_v56 }
 0x2df   :  { %v1288_v26 = vrot.slane %v1278_v63, 4 }
 0x2e1   :  { %v1093_v14 = vpop.xlane.xlu1 %1092 }
 0x2e2   :  { %1707 = vrcp.f32 %v1093_v14  ;;  %v1099_v7 = vpop.xlane.xlu2 %1098 }
 0x2e3   :  { %1709 = vrcp.f32 %v1096_v34 }
 0x2e4   :  { %v1135_v46 = vpop.f32.mrf.mxu1  ;;  %v1190_v25 = vpop.f32.mrf.mxu0 }
 0x2e5   :  { %v1171_v29 = vpop.f32.mrf.mxu3 }
 0x2e8   :  { %v1708_v38 = vpop.eup %1707  ;;  %v1152_v62 = vpop.f32.mrf.mxu2 }
 0x2e9   :  { %v1280_v3 = vmul.f32 %v1708_v38, %v1171_v29  ;;  %v1090_v9 = vpop.xlane.xlu1 %1089  ;;  %v1710_v49 = vpop.eup %1709 }
 0x2ea   :  { %1711 = vrcp.f32 %v1090_v9  ;;  %v1105_v16 = vpop.xlane.xlu2 %1104  ;;  %v1281_v39 = vmul.f32 %v1710_v49, %v1190_v25 }
 0x2eb   :  { %v1286_v15 = vrot.slane %v1280_v3, 4  ;;  %v1289_v24 = vsel %vm169_vm1, %v1280_v3, %v1288_v26  ;;  %1713 = vrcp.f32 %v1099_v7 }
 0x2ec   :  { %v1192_v8 = vpop.f32.mrf.mxu0  ;;  %v1298_v6 = vrot.slane %v1281_v39, 4  ;;  %v1297_v48 = vperm.slane %v1289_v24, %v1903_v18  ;;  %1715 = vrcp.f32 %v1105_v16 }
 0x2ed   :  { %v1287_v1 = vsel %vm169_vm1, %v1286_v15, %v1278_v63  ;;  %v1209_v35 = vpop.f32.mrf.mxu1  ;;  %v1173_v12 = vpop.f32.mrf.mxu3 }
 0x2ee   :  { %v1293_v33 = vperm.slane %v1287_v1, %v1903_v18  ;;  %v1324_v28 = vrot.slane %v1297_v48, 4 }
 0x2f0   :  { %v1712_v32 = vpop.eup %1711  ;;  %v1154_v47 = vpop.f32.mrf.mxu2  ;;  %v1312_v2 = vrot.slane %v1293_v33, 4 }
 0x2f1   :  { %v1279_v23 = vmul.f32 %v1712_v32, %v1152_v62  ;;  %v1714_v42 = vpop.eup %1713  ;;  %v1108_v57 = vpop.xlane.xlu0 %1107 }
 0x2f2   :  { %v1102_v17 = vpop.xlane.xlu2 %1101  ;;  %v1282_v53 = vmul.f32 %v1714_v42, %v1209_v35  ;;  %v1716_v21 = vpop.eup %1715 }
 0x2f3   :  { %v1299_v44 = vsel %vm169_vm1, %v1298_v6, %v1279_v23  ;;  %v1300_v5 = vrot.slane %v1279_v23, 4  ;;  %1717 = vrcp.f32 %v1102_v17 }
 0x2f4   :  { %v1305_v4 = vperm.slane %v1299_v44, %v1903_v18  ;;  %1719 = vrcp.f32 %v1108_v57  ;;  %v1344_v43 = vrot.slane %v1282_v53, 4 }
 0x2f5   :  { %v1301_v10 = vsel %vm169_vm1, %v1281_v39, %v1300_v5  ;;  %v1211_v19 = vpop.f32.mrf.mxu1 }
 0x2f6   :  { %v1309_v60 = vperm.slane %v1301_v10, %v1903_v18  ;;  %v1310_v41 = vrot.slane %v1305_v4, 4  ;;  %v1313_v20 = vsel %vm169_vm1, %v1305_v4, %v1312_v2 }
 0x2f7   :  { %v1321_v11 = vperm.slane %v1313_v20, %v1918_v40 }
 0x2f8   :  { %v1311_v50 = vsel %vm169_vm1, %v1310_v41, %v1293_v33  ;;  %v1322_v45 = vrot.slane %v1309_v60, 4  ;;  %v1325_v30 = vsel %vm169_vm1, %v1309_v60, %v1324_v28  ;;  %v1228_v13 = vpop.f32.mrf.mxu2 }
 0x2f9   :  { %v1718_v36 = vpop.eup %1717  ;;  %v1317_v27 = vperm.slane %v1311_v50, %v1918_v40  ;;  %v1333_v58 = vperm.slane %v1325_v30, %v1918_v40  ;;  %v1336_v54 = vrot.slane %v1321_v11, 4  ;;  %v1247_v22 = vpop.f32.mrf.mxu3 }
 0x2fa   :  { %v1323_v0 = vsel %vm169_vm1, %v1322_v45, %v1297_v48  ;;  %v1284_v37 = vmul.f32 %v1716_v21, %v1247_v22  ;;  %v1283_v59 = vmul.f32 %v1718_v36, %v1228_v13  ;;  %v1720_v63 = vpop.eup %1719 }
 0x2fb   :  { %v1329_v52 = vperm.slane %v1323_v0, %v1918_v40  ;;  %v1334_v51 = vrot.slane %v1317_v27, 4  ;;  %v1337_v31 = vsel %vm169_vm1, 0.0, %v1336_v54  ;;  %v1340_v34 = vrot.slane %v1333_v58, 4  ;;  %v1266_v56 = vpop.f32.mrf.mxu0 }
 0x2fc   :  { %v1398_v61 = vsel %vm169_vm1, %v1336_v54, %v1317_v27  ;;  %v1403_v14 = vrot.slane %v1337_v31, 4  ;;  %v1342_v7 = vrot.slane %v1284_v37, 4  ;;  %v1345_v46 = vsel %vm169_vm1, %v1284_v37, %v1344_v43 }
 0x2fd   :  { %v1335_v25 = vsel %vm169_vm1, 0.0, %v1334_v51  ;;  %v1338_v29 = vrot.slane %v1329_v52, 4  ;;  %v1341_v55 = vsel %vm169_vm1, 0.0, %v1340_v34  ;;  %v1402_v38 = vperm.slane %v1398_v61, %v1903_v18 }
 0x2fe   :  { %v1414_v62 = vrot.slane %v1341_v55, 4  ;;  %v1343_v3 = vsel %vm169_vm1, %v1342_v7, %v1282_v53  ;;  %v1353_v9 = vperm.slane %v1345_v46, %v1903_v18  ;;  %v1356_v16 = vrot.slane %v1283_v59, 4 }
 0x2ff   :  { %v1349_v15 = vperm.slane %v1343_v3, %v1903_v18  ;;  %v1285_v49 = vmul.f32 %v1720_v63, %v1266_v56  ;;  %v1339_v26 = vsel %vm169_vm1, 0.0, %v1338_v29  ;;  %v1404_v8 = vsel %vm169_vm1, %v1403_v14, %v1335_v25 }
 0x300   :  { %v1230_v39 = vpop.f32.mrf.mxu2  ;;  %v1409_v1 = vsel %vm169_vm1, %v1340_v34, %v1329_v52  ;;  %v1415_v35 = vsel %vm169_vm1, %v1414_v62, %v1339_v26  ;;  %v1380_v12 = vrot.slane %v1353_v9, 4  ;;  %v1408_v23 = vperm.slane %v1404_v8, %v1903_v18 }
 0x301   :  { %v1354_v24 = vrot.slane %v1285_v49, 4  ;;  %v1357_v32 = vsel %vm169_vm1, %v1285_v49, %v1356_v16  ;;  %v1249_v33 = vpop.f32.mrf.mxu3  ;;  %v1413_v47 = vperm.slane %v1409_v1, %v1903_v18  ;;  %v1368_v6 = vrot.slane %v1349_v15, 4 }
 0x302   :  { %v1365_v48 = vperm.slane %v1357_v32, %v1903_v18  ;;  %v1422_v17 = vrot.slane %v1402_v38, 4  ;;  %v1419_v2 = vperm.slane %v1415_v35, %v1903_v18  ;;  %v1420_v30 = vrot.slane %v1408_v23, 4 }
 0x303   :  { %v1355_v44 = vsel %vm169_vm1, %v1354_v24, %v1283_v59  ;;  %v1268_v5 = vpop.f32.mrf.mxu0  ;;  %v1434_v4 = vrot.slane %v1413_v47, 4 }
 0x304   :  { %v1361_v42 = vperm.slane %v1355_v44, %v1903_v18  ;;  %v1378_v28 = vrot.slane %v1365_v48, 4  ;;  %v1381_v10 = vsel %vm169_vm1, %v1365_v48, %v1380_v12  ;;  %v1423_v20 = vsel %vm169_vm1, %v1408_v23, %v1422_v17 }
 0x305   :  { %v1389_v57 = vperm.slane %v1381_v10, %v1918_v40  ;;  %v1435_v50 = vsel %vm169_vm1, %v1419_v2, %v1434_v4  ;;  %v1432_v13 = vrot.slane %v1419_v2, 4  ;;  %v1431_v43 = vperm.slane %v1423_v20, %v1918_v40  ;;  %v1630_v20 = vld [vmem:[#allocation7] sm:$0xff] }
 0x306   :  { %v1366_v19 = vrot.slane %v1361_v42, 4  ;;  %v1369_v60 = vsel %vm169_vm1, %v1361_v42, %v1368_v6  ;;  %v1379_v41 = vsel %vm169_vm1, %v1378_v28, %v1353_v9  ;;  %v1443_v37 = vperm.slane %v1435_v50, %v1918_v40 }
 0x307   :  { %v1377_v53 = vperm.slane %v1369_v60, %v1918_v40  ;;  %v1385_v11 = vperm.slane %v1379_v41, %v1918_v40  ;;  %v1396_v21 = vrot.slane %v1389_v57, 4  ;;  %v1421_v25 = vsel %vm169_vm1, %v1420_v30, %v1402_v38  ;;  %v1631_v41 = vld [vmem:[#allocation7 + $0x8] sm:$0xff] }
 0x308   :  { %v1367_v45 = vsel %vm169_vm1, %v1366_v19, %v1349_v15  ;;  %v1433_v29 = vsel %vm169_vm1, %v1432_v13, %v1413_v47  ;;  %v1450_v9 = vrot.slane %v1431_v43, 4  ;;  %v1448_v26 = vrot.slane %v1443_v37, 4  ;;  %1564 = vmatpush.bf16.msra.mxu1 %v1631_v41 }
 0x309   :  { %v1373_v36 = vperm.slane %v1367_v45, %v1918_v40  ;;  %v1392_v27 = vrot.slane %v1377_v53, 4  ;;  %v1394_v58 = vrot.slane %v1385_v11, 4  ;;  %v1397_v54 = vsel %vm169_vm1, 0.0, %v1396_v21 }
 0x30a   :  { %v1463_v22 = vsel %vm169_vm1, %v1396_v21, %v1385_v11  ;;  %v1468_v0 = vrot.slane %v1397_v54, 4  ;;  %v1439_v3 = vperm.slane %v1433_v29, %v1918_v40  ;;  %v1427_v8 = vperm.slane %v1421_v25, %v1918_v40 }
 0x30b   :  { %v1390_v59 = vrot.slane %v1373_v36, 4  ;;  %v1393_v52 = vsel %vm169_vm1, 0.0, %v1392_v27  ;;  %v1395_v51 = vsel %vm169_vm1, 0.0, %v1394_v58  ;;  %v1452_v31 = vsel %vm169_vm1, %v1392_v27, %v1373_v36 }
 0x30c   :  { %v1457_v34 = vrot.slane %v1393_v52, 4  ;;  %v1456_v56 = vperm.slane %v1452_v31, %v1903_v18  ;;  %v1467_v61 = vperm.slane %v1463_v22, %v1903_v18  ;;  %v1469_v14 = vsel %vm169_vm1, %v1468_v0, %v1395_v51  ;;  %1565 = vmatpush.bf16.msra.mxu1 %v1630_v20 }
 0x30d   :  { %v1391_v7 = vsel %vm169_vm1, 0.0, %v1390_v59  ;;  %v1473_v46 = vperm.slane %v1469_v14, %v1903_v18  ;;  %v1444_v39 = vrot.slane %v1439_v3, 4  ;;  %v1446_v48 = vrot.slane %v1427_v8, 4 }
 0x30e   :  { %v1458_v55 = vsel %vm169_vm1, %v1457_v34, %v1391_v7  ;;  %v1476_v63 = vrot.slane %v1456_v56, 4  ;;  %v1488_v62 = vrot.slane %v1467_v61, 4  ;;  %v1451_v44 = vsel %vm169_vm1, %v1443_v37, %v1450_v9 }
 0x30f   :  { %v1462_v16 = vperm.slane %v1458_v55, %v1903_v18  ;;  %v1486_v15 = vrot.slane %v1473_v46, 4  ;;  %v1445_v18 = vsel %vm169_vm1, %v1444_v39, %v1427_v8  ;;  %v1449_v5 = vsel %vm169_vm1, %v1448_v26, %v1431_v43 }
 0x310   :  { %v1489_v49 = vsel %vm169_vm1, %v1473_v46, %v1488_v62  ;;  %v1447_v19 = vsel %vm169_vm1, %v1439_v3, %v1446_v48 }
 0x311   :  { %v1477_v38 = vsel %vm169_vm1, %v1462_v16, %v1476_v63  ;;  %v1497_v1 = vperm.slane %v1489_v49, %v1918_v40  ;;  %v1474_v35 = vrot.slane %v1462_v16, 4  ;;  %v1487_v12 = vsel %vm169_vm1, %v1486_v15, %v1467_v61 }
 0x312   :  { %v1485_v24 = vperm.slane %v1477_v38, %v1918_v40  ;;  %v1493_v32 = vperm.slane %v1487_v12, %v1918_v40 }
 0x313   :  { %v1502_v33 = vrot.slane %v1497_v1, 4  ;;  %v1475_v47 = vsel %vm169_vm1, %v1474_v35, %v1456_v56 }
 0x314   :  { %v1504_v6 = vrot.slane %v1485_v24, 4  ;;  %v1481_v23 = vperm.slane %v1475_v47, %v1918_v40  ;;  %v1498_v17 = vrot.slane %v1493_v32, 4 }
 0x315   :  { %v1503_v2 = vsel %vm169_vm1, %v1502_v33, %v1485_v24 }
 0x316   :  { %v1505_v4 = vsel %vm169_vm1, %v1497_v1, %v1504_v6  ;;  %v1679_v42 = vpack.i.bf16 %v1503_v2, %v1449_v5  ;;  %v1500_v28 = vrot.slane %v1481_v23, 4  ;;  %v1499_v10 = vsel %vm169_vm1, %v1498_v17, %v1481_v23 }
 0x317   :  { %v1684_v57 = vpack.i.bf16 %v1505_v4, %v1451_v44 }
 0x318   :  { %1680 = vrot.lane.b32.xlu1 %v1679_v42, %s1842_s11  ;;  %v1501_v40 = vsel %vm169_vm1, %v1493_v32, %v1500_v28 }
 0x319   :  { %1685 = vrot.lane.b32.xlu2 %v1684_v57, %s1843_s12  ;;  %v1674_v60 = vpack.i.bf16 %v1501_v40, %v1447_v19 }
 0x31b   :  { %1675 = vrot.lane.b32.xlu0 %v1674_v60, %s1828_s1 }
 0x373   :  { %v1686_v11 = vpop.permute.xlu2 %1685 }
 0x374   :  { %v1688_v36 = vunpack.i.h.bf16 %v1686_v11  ;;  %v1687_v27 = vunpack.i.l.bf16 %v1686_v11 }
 0x38a   :  { %v1681_v53 = vpop.permute.xlu1 %1680 }
 0x38b   :  { %v1683_v30 = vunpack.i.h.bf16 %v1681_v53  ;;  %v1682_v13 = vunpack.i.l.bf16 %v1681_v53 }
 0x38d   :  { %v1676_v21 = vpop.permute.xlu0 %1675 }
 0x38e   :  { %v1678_v50 = vunpack.i.h.bf16 %v1676_v21  ;;  %v1677_v45 = vunpack.i.l.bf16 %v1676_v21 }
 0x390   :  { %v1530_v58 = vsel %vm869_vm2, %v1445_v18, %v1677_v45  ;;  %v1531_v54 = vsel %vm869_vm2, %v1499_v10, %v1678_v50 }
 0x391   :  { %v1533_v22 = vsel %vm1532_vm5, %v1530_v58, %v1682_v13  ;;  %v1534_v0 = vsel %vm1532_vm5, %v1531_v54, %v1683_v30 }
 0x392   :  { %v1536_v43 = vsel %vm1535_vm6, %v1533_v22, %v1687_v27  ;;  %v1537_v37 = vsel %vm1535_vm6, %v1534_v0, %v1688_v36 }
 0x393   :  { %v1538_v59 = vpack.c.bf16 %v1537_v37, %v1536_v43 }
 0x395   :  { %1627 = vmatmul.msk.bf16.vlgmr.msra.gmra.mxu1 %vm82_vm0, %v1538_v59 }
 0x412   :  { %v1567_v52 = vpop.f32.mrf.mxu1 }
 0x413   :  { %1572 = vst.msk [vmem:[#allocation8] sm:$0xff] %vm82_vm0, %v1567_v52 }
 0x41a   :  { %v1569_v51 = vpop.f32.mrf.mxu1 }
 0x41b   :  { %1573 = vst.msk [vmem:[#allocation8 + $0x8] sm:$0xff] %vm82_vm0, %v1569_v51 }
 0x41c   :  { %1586 = dma.vmem_to_hbm [thread:$0]  %s1579_s14, 256, %s1581_s17, [#allocation4], %s1827_s24, %s1827_s24, %s1828_s1  }
 0x41d   :  { %1821 = dma.done.wait [#allocation4], 256  }
 0x41e   :  { %1822 = vsyncadd [#allocation4], 4294967040 }
 0x41f   :  { %1591 = vsyncpa [#allocation3], 1 }
 0x420   :  { %1592 = vsyncpa [#allocation6], 1 }
 0x421   :  { %1593 = vsyncpa [#allocation4], 1 }

</bundles_post_ra>
